<compile_context>
chip_gen: v5e
topology: v5e:2x2
jax: 0.10.0
libtpu: 0.0.40
codegen_flags: <defaults>
</compile_context>

<pallas_src>
import jax
import jax.numpy as jnp
from jax.experimental import pallas as pl
from jax.experimental.pallas import tpu as pltpu


def _round_up(n, m):
    return ((n + m - 1) // m) * m


def _mlp_kernel(x_ref, w0_ref, b0_ref, w1_ref, b1_ref, w2_ref, b2_ref, o_ref):
    x = x_ref[...]                                                   # [T, 20] f32

    # dense0: [T, 20] @ [20, U] + [1, U], ReLU (f32 accumulate)
    h0 = jnp.dot(x, w0_ref[...], preferred_element_type=jnp.float32) + b0_ref[...]
    h0 = jnp.maximum(h0, 0.0)

    # dropout(p=0.5): identity in eval mode.
    # TODO(synk): training-mode dropout (stochastic mask via pltpu.prng_random_bits) not implemented.

    # dense1: [T, U] @ [U, 10] + [1, 10], ReLU
    h1 = jnp.dot(h0, w1_ref[...], preferred_element_type=jnp.float32) + b1_ref[...]
    h1 = jnp.maximum(h1, 0.0)

    # output head + numerically-stable 2-class softmax, both columns emitted here
    logits = jnp.dot(h1, w2_ref[...], preferred_element_type=jnp.float32) + b2_ref[...]  # [T, 2]
    m = jnp.max(logits, axis=-1, keepdims=True)
    e = jnp.exp(logits - m)
    o_ref[...] = e / jnp.sum(e, axis=-1, keepdims=True)              # [T, 2] f32


def my_classifier_forward(x, params, *, max_tile_n=2048, min_programs=2):
    """x: [N, 20] f32. params: f32 dict (w0,b0,w1,b1,w2,b2). Returns [N, 2] softmax probs."""
    n, feat = x.shape

    # Batch tile: aim for >= min_programs grid steps (v7x megacore), cap at
    # max_tile_n (VMEM headroom on v5e), keep 8-row (f32 sublane) alignment.
    tile_n = min(max_tile_n, max(8, _round_up(pl.cdiv(n, min_programs), 8)))
    tile_n = min(tile_n, _round_up(n, 8))
    grid = (pl.cdiv(n, tile_n),)

    w0 = params["w0"].astype(jnp.float32)   # [20, U]
    b0 = params["b0"].astype(jnp.float32)   # [1, U]
    w1 = params["w1"].astype(jnp.float32)   # [U, 10]
    b1 = params["b1"].astype(jnp.float32)   # [1, 10]
    w2 = params["w2"].astype(jnp.float32)   # [10, 2]
    b2 = params["b2"].astype(jnp.float32)   # [1, 2]

    def resident(shape):
        # Constant block index -> DMA'd once, stays resident in VMEM across all steps.
        return pl.BlockSpec(shape, lambda i: (0, 0))

    return pl.pallas_call(
        _mlp_kernel,
        out_shape=jax.ShapeDtypeStruct((n, 2), jnp.float32),
        grid=grid,
        in_specs=[
            pl.BlockSpec((tile_n, feat), lambda i: (i, 0)),          # x: tiled over batch
            resident(w0.shape), resident(b0.shape),
            resident(w1.shape), resident(b1.shape),
            resident(w2.shape), resident(b2.shape),
        ],
        out_specs=pl.BlockSpec((tile_n, 2), lambda i: (i, 0)),
        compiler_params=pltpu.CompilerParams(
            dimension_semantics=("parallel",)),                      # shard batch across TCs (v7x)
    )(x.astype(jnp.float32), w0, b0, w1, b1, w2, b2)


def init_params(key, num_units=10):
    """Deterministic Kaiming-uniform-ish init matching nn.Linear shapes."""
    ks = jax.random.split(key, 6)

    def linear(kw, kb, fan_in, fan_out):
        bound = 1.0 / jnp.sqrt(float(fan_in))
        w = jax.random.uniform(kw, (fan_in, fan_out), jnp.float32, -bound, bound)
        b = jax.random.uniform(kb, (1, fan_out), jnp.float32, -bound, bound)
        return w, b

    w0, b0 = linear(ks[0], ks[1], 20, num_units)
    w1, b1 = linear(ks[2], ks[3], num_units, 10)
    w2, b2 = linear(ks[4], ks[5], 10, 2)
    return {"w0": w0, "b0": b0, "w1": w1, "b1": b1, "w2": w2, "b2": b2}


def _reference_forward(x, params):
    """Pure-JAX f32 reference (eval-mode dropout = identity)."""
    h0 = jnp.maximum(x @ params["w0"] + params["b0"], 0.0)
    h1 = jnp.maximum(h0 @ params["w1"] + params["b1"], 0.0)
    logits = h1 @ params["w2"] + params["b2"]
    return jax.nn.softmax(logits, axis=-1)


if __name__ == "__main__":
    key = jax.random.PRNGKey(0)
    k_x, k_p, k_x2 = jax.random.split(key, 3)
    params = init_params(k_p, num_units=10)

    # small batch (single tile)
    batch = 8
    x = jax.random.normal(k_x, (batch, 20), dtype=jnp.float32)
    out = jax.block_until_ready(my_classifier_forward(x, params))
    assert out.shape == (batch, 2)
    assert jnp.allclose(jnp.sum(out, axis=-1), 1.0, atol=1e-5)
    ref = _reference_forward(x, params)
    assert jnp.allclose(out, ref, atol=1e-4), (out, ref)

    # non-multiple-of-8 batch (multi-tile + masked partial last tile)
    batch2 = 36
    x2 = jax.random.normal(k_x2, (batch2, 20), dtype=jnp.float32)
    out2 = jax.block_until_ready(my_classifier_forward(x2, params))
    assert out2.shape == (batch2, 2)
    assert jnp.allclose(jnp.sum(out2, axis=-1), 1.0, atol=1e-5)
    ref2 = _reference_forward(x2, params)
    assert jnp.allclose(out2, ref2, atol=1e-4), (out2, ref2)

    print("KERNEL_OK")
</pallas_src>

<mosaic_0001>
module attributes {stable_mosaic.version = 11 : i64} {
  func.func @_mlp_kernel(%arg0: i32, %arg1: memref<8x20xf32, #tpu.memory_space<vmem>>, %arg2: memref<20x10xf32, #tpu.memory_space<vmem>>, %arg3: memref<1x10xf32, #tpu.memory_space<vmem>>, %arg4: memref<10x10xf32, #tpu.memory_space<vmem>>, %arg5: memref<1x10xf32, #tpu.memory_space<vmem>>, %arg6: memref<10x2xf32, #tpu.memory_space<vmem>>, %arg7: memref<1x2xf32, #tpu.memory_space<vmem>>, %arg8: memref<8x2xf32, #tpu.memory_space<vmem>>) attributes {dimension_semantics = [#tpu.dimension_semantics<parallel>], iteration_bounds = array<i64: 1>, scalar_prefetch = 0 : i64, scratch_operands = 0 : i64, tpu.core_type = #tpu.core_type<tc>, window_params = [{transform_indices = @transform_0, window_bounds = array<i64: 8, 20>}, {pipeline_mode = #tpu.pipeline_mode<synchronous>, transform_indices = @transform_1, window_bounds = array<i64: 20, 10>}, {pipeline_mode = #tpu.pipeline_mode<synchronous>, transform_indices = @transform_2, window_bounds = array<i64: 1, 10>}, {pipeline_mode = #tpu.pipeline_mode<synchronous>, transform_indices = @transform_3, window_bounds = array<i64: 10, 10>}, {pipeline_mode = #tpu.pipeline_mode<synchronous>, transform_indices = @transform_4, window_bounds = array<i64: 1, 10>}, {pipeline_mode = #tpu.pipeline_mode<synchronous>, transform_indices = @transform_5, window_bounds = array<i64: 10, 2>}, {pipeline_mode = #tpu.pipeline_mode<synchronous>, transform_indices = @transform_6, window_bounds = array<i64: 1, 2>}, {transform_indices = @transform_7, window_bounds = array<i64: 8, 2>}]} {
    %c0 = arith.constant 0 : index
    %c0_0 = arith.constant 0 : index
    %0 = vector.load %arg1[%c0, %c0_0] : memref<8x20xf32, #tpu.memory_space<vmem>>, vector<8x20xf32>
    %c0_1 = arith.constant 0 : index
    %c0_2 = arith.constant 0 : index
    %1 = vector.load %arg2[%c0_1, %c0_2] : memref<20x10xf32, #tpu.memory_space<vmem>>, vector<20x10xf32>
    %cst = arith.constant dense<0.000000e+00> : vector<8x10xf32>
    %2 = tpu.matmul %0, %1, %cst {dimension_numbers = #tpu.dot_dimension_numbers<[1], [0], [0], [1], [0, 0, 1, 1], [], []>} : vector<8x20xf32>, vector<20x10xf32>, vector<8x10xf32> -> vector<8x10xf32>
    %c0_3 = arith.constant 0 : index
    %c0_4 = arith.constant 0 : index
    %3 = vector.load %arg3[%c0_3, %c0_4] : memref<1x10xf32, #tpu.memory_space<vmem>>, vector<1x10xf32>
    %4 = vector.broadcast %3 : vector<1x10xf32> to vector<8x10xf32>
    %5 = arith.addf %2, %4 : vector<8x10xf32>
    %cst_5 = arith.constant 0.000000e+00 : f32
    %6 = vector.broadcast %cst_5 : f32 to vector<8x10xf32>
    %7 = arith.maximumf %5, %6 : vector<8x10xf32>
    %c0_6 = arith.constant 0 : index
    %c0_7 = arith.constant 0 : index
    %8 = vector.load %arg4[%c0_6, %c0_7] : memref<10x10xf32, #tpu.memory_space<vmem>>, vector<10x10xf32>
    %cst_8 = arith.constant dense<0.000000e+00> : vector<8x10xf32>
    %9 = tpu.matmul %7, %8, %cst_8 {dimension_numbers = #tpu.dot_dimension_numbers<[1], [0], [0], [1], [0, 0, 1, 1], [], []>} : vector<8x10xf32>, vector<10x10xf32>, vector<8x10xf32> -> vector<8x10xf32>
    %c0_9 = arith.constant 0 : index
    %c0_10 = arith.constant 0 : index
    %10 = vector.load %arg5[%c0_9, %c0_10] : memref<1x10xf32, #tpu.memory_space<vmem>>, vector<1x10xf32>
    %11 = vector.broadcast %10 : vector<1x10xf32> to vector<8x10xf32>
    %12 = arith.addf %9, %11 : vector<8x10xf32>
    %cst_11 = arith.constant 0.000000e+00 : f32
    %13 = vector.broadcast %cst_11 : f32 to vector<8x10xf32>
    %14 = arith.maximumf %12, %13 : vector<8x10xf32>
    %c0_12 = arith.constant 0 : index
    %c0_13 = arith.constant 0 : index
    %15 = vector.load %arg6[%c0_12, %c0_13] : memref<10x2xf32, #tpu.memory_space<vmem>>, vector<10x2xf32>
    %cst_14 = arith.constant dense<0.000000e+00> : vector<8x2xf32>
    %16 = tpu.matmul %14, %15, %cst_14 {dimension_numbers = #tpu.dot_dimension_numbers<[1], [0], [0], [1], [0, 0, 1, 1], [], []>} : vector<8x10xf32>, vector<10x2xf32>, vector<8x2xf32> -> vector<8x2xf32>
    %c0_15 = arith.constant 0 : index
    %c0_16 = arith.constant 0 : index
    %17 = vector.load %arg7[%c0_15, %c0_16] : memref<1x2xf32, #tpu.memory_space<vmem>>, vector<1x2xf32>
    %18 = vector.broadcast %17 : vector<1x2xf32> to vector<8x2xf32>
    %19 = arith.addf %16, %18 : vector<8x2xf32>
    %cst_17 = arith.constant dense<0xFF800000> : vector<8xf32>
    %20 = vector.multi_reduction <maximumf>, %19, %cst_17 [1] : vector<8x2xf32> to vector<8xf32>
    %21 = vector.shape_cast %20 : vector<8xf32> to vector<8x1xf32>
    %22 = vector.broadcast %21 : vector<8x1xf32> to vector<8x2xf32>
    %23 = arith.subf %19, %22 : vector<8x2xf32>
    %24 = math.exp %23 : vector<8x2xf32>
    %cst_18 = arith.constant dense<0.000000e+00> : vector<8xf32>
    %25 = vector.multi_reduction <add>, %24, %cst_18 [1] : vector<8x2xf32> to vector<8xf32>
    %26 = vector.shape_cast %25 : vector<8xf32> to vector<8x1xf32>
    %27 = vector.broadcast %26 : vector<8x1xf32> to vector<8x2xf32>
    %28 = arith.divf %24, %27 : vector<8x2xf32>
    %c0_19 = arith.constant 0 : index
    %c0_20 = arith.constant 0 : index
    %29 = vector.load %arg8[%c0_19, %c0_20] : memref<8x2xf32, #tpu.memory_space<vmem>>, vector<8x2xf32>
    tpu.vector_store %arg8[%c0_19, %c0_20], %28 {strides = array<i32>} : memref<8x2xf32, #tpu.memory_space<vmem>>, vector<8x2xf32>,
    return
  }
  func.func @transform_0(%arg0: i32) -> (i32, i32) {
    %c0_i32 = arith.constant 0 : i32
    %c0_i32_0 = arith.constant 0 : i32
    return %arg0, %c0_i32 : i32, i32
  }
  func.func @transform_1(%arg0: i32) -> (i32, i32) {
    %c0_i32 = arith.constant 0 : i32
    %c0_i32_0 = arith.constant 0 : i32
    %c0_i32_1 = arith.constant 0 : i32
    return %c0_i32, %c0_i32_0 : i32, i32
  }
  func.func @transform_2(%arg0: i32) -> (i32, i32) {
    %c0_i32 = arith.constant 0 : i32
    %c0_i32_0 = arith.constant 0 : i32
    %c0_i32_1 = arith.constant 0 : i32
    return %c0_i32, %c0_i32_0 : i32, i32
  }
  func.func @transform_3(%arg0: i32) -> (i32, i32) {
    %c0_i32 = arith.constant 0 : i32
    %c0_i32_0 = arith.constant 0 : i32
    %c0_i32_1 = arith.constant 0 : i32
    return %c0_i32, %c0_i32_0 : i32, i32
  }
  func.func @transform_4(%arg0: i32) -> (i32, i32) {
    %c0_i32 = arith.constant 0 : i32
    %c0_i32_0 = arith.constant 0 : i32
    %c0_i32_1 = arith.constant 0 : i32
    return %c0_i32, %c0_i32_0 : i32, i32
  }
  func.func @transform_5(%arg0: i32) -> (i32, i32) {
    %c0_i32 = arith.constant 0 : i32
    %c0_i32_0 = arith.constant 0 : i32
    %c0_i32_1 = arith.constant 0 : i32
    return %c0_i32, %c0_i32_0 : i32, i32
  }
  func.func @transform_6(%arg0: i32) -> (i32, i32) {
    %c0_i32 = arith.constant 0 : i32
    %c0_i32_0 = arith.constant 0 : i32
    %c0_i32_1 = arith.constant 0 : i32
    return %c0_i32, %c0_i32_0 : i32, i32
  }
  func.func @transform_7(%arg0: i32) -> (i32, i32) {
    %c0_i32 = arith.constant 0 : i32
    %c0_i32_0 = arith.constant 0 : i32
    return %arg0, %c0_i32 : i32, i32
  }
}

</mosaic_0001>

<bundles_post_ra>
// kernel: tpu_custom_call.1
= control target key start
LH: loop header
LB: loop body
LE: loop exit
PB: predicated region body
PF: predicated region fallthrough
CT: control target
= control target key end

     0   :  { %vm38_vm0 = vcmask 1043456   ;;  %vm34_vm1 = vcmask 162816   ;;  %vm73_vm2 = vcmask 1041408   ;;  %vm69_vm3 = vcmask 80896   ;;  %s252_s1 = inlined_call_operand.vmem [shape: f32[20,10], index: 1, kind: input, shape index: {}]   ;;  %s253_s0 = inlined_call_operand.vmem [shape: f32[8,20], index: 0, kind: input, shape index: {}]   ;;  %s254_s2 = inlined_call_operand.vmem [shape: f32[1,10], index: 2, kind: input, shape index: {}]   ;;  %s255_s4 = inlined_call_operand.vmem [shape: f32[1,10], index: 4, kind: input, shape index: {}]   ;;  %s256_s3 = inlined_call_operand.vmem [shape: f32[10,10], index: 3, kind: input, shape index: {}]   ;;  %s257_s6 = inlined_call_operand.vmem [shape: f32[1,2], index: 6, kind: input, shape index: {}]   ;;  %s258_s5 = inlined_call_operand.vmem [shape: f32[10,2], index: 5, kind: input, shape index: {}]   ;;  %s259_s7 = inlined_call_operand.vmem [shape: f32[8,2], index: 7, kind: output, shape index: {}]  }
   0x1   :  { %v29_v0 = vld [vmem:[%s252_s1 + $0x10] sm:$0xf]  ;;  %v28_v1 = vld [vmem:[%s252_s1 + $0x8] sm:$0xff]  ;;  %v27_v2 = vld [vmem:[%s252_s1] sm:$0xff]  ;;  %vm130_vm4 = vcmask 15360  }
   0x2   :  { %160 = vmatpush.msk.msra.mxu0 %vm38_vm0, %v29_v0  ;;  %v26_v3 = vld [vmem:[%s253_s0] sm:$0xff]  ;;  %v64_v4 = vld [vmem:[%s256_s3 + $0x8] sm:$0x3] }
   0x3   :  { %162 = vmatpush.msk.msra.mxu1 %vm73_vm2, %v64_v4  ;;  %v63_v5 = vld [vmem:[%s256_s3] sm:$0xff]  ;;  %v99_v10 = vld [vmem:[%s258_s5 + $0x8] sm:$0x3] }
   0x4   :  { %56 = vmatpush.msra.mxu0 %v28_v1  ;;  %v166_v6 = vld [vmem:[%s254_s2] ss:$0 sm:$0xff]  ;;  %164 = vmatpush.msk.msra.mxu2 %vm73_vm2, %v99_v10 }
   0x5   :  { %92 = vmatpush.msra.mxu1 %v63_v5  ;;  %v98_v11 = vld [vmem:[%s258_s5] sm:$0xff] }
   0x6   :  { %57 = vmatpush.msra.mxu0 %v27_v2  ;;  %125 = vmatpush.msra.mxu2 %v98_v11  ;;  %v167_v12 = vld [vmem:[%s255_s4] ss:$0 sm:$0xff] }
   0x7   :  { %161 = vmatmul.msk.f32.vlgmr.msra.gmra.mxu0 %vm34_vm1, %v26_v3  ;;  %v168_v16 = vld [vmem:[%s257_s6] ss:$0 sm:$0xff] }
  0x84   :  { %v59_v7 = vpop.f32.mrf.mxu0 }
  0x85   :  { %v60_v8 = vadd.f32 %v166_v6, %v59_v7 }
  0x87   :  { %v62_v9 = vmax.f32 %v60_v8, 0.0 }
  0x89   :  { %163 = vmatmul.msk.f32.vlgmr.msra.gmra.mxu1 %vm69_vm3, %v62_v9 }
 0x106   :  { %v94_v13 = vpop.f32.mrf.mxu1 }
 0x107   :  { %v95_v14 = vadd.f32 %v167_v12, %v94_v13 }
 0x109   :  { %v97_v15 = vmax.f32 %v95_v14, 0.0 }
 0x10b   :  { %165 = vmatmul.msk.f32.vlgmr.msra.gmra.mxu2 %vm69_vm3, %v97_v15 }
 0x18e   :  { %v127_v17 = vpop.f32.mrf.mxu2 }
 0x18f   :  { %v128_v18 = vadd.f32 %v168_v16, %v127_v17 }
 0x191   :  { %v131_v19 = vsel %vm130_vm4, %v128_v18, -inf }
 0x192   :  { %132 = vmax.xlane.f32.xlu0 %v131_v19 }
 0x205   :  { %v133_v20 = vpop.xlane.xlu0 %132 }
 0x206   :  { %v134_v21 = vsub.f32 %v128_v18, %v133_v20 }
 0x208   :  { %v135_v22 = vmul.f32 1.442695, %v134_v21 }
 0x20a   :  { %169 = vpow2.f32 %v135_v22 }
 0x210   :  { %v170_v23 = vpop.eup %169 }
 0x211   :  { %v137_v24 = vsel %vm130_vm4, %v170_v23, 0.0 }
 0x212   :  { %138 = vadd.xlane.f32.xlu0 %v137_v24 }
 0x285   :  { %v139_v25 = vpop.xlane.xlu0 %138 }
 0x286   :  { %171 = vrcp.f32 %v139_v25  ;;  %v151_v29 = vand.u32 2147483648, %v139_v25  ;;  %v149_v31 = vand.u32 2147483647, %v139_v25  ;;  %vm145_vm6 = vweird.f32 %v139_v25 }
 0x288   :  { %v152_v33 = vor.u32 1.1754944e-38, %v151_v29  ;;  %vm150_vm8 = vcmp.eq.f32.partialorder %v149_v31, 8.507059e+37 }
 0x28c   :  { %v172_v26 = vpop.eup %171 }
 0x28d   :  { %v141_v27 = vmul.f32 %v172_v26, %v139_v25  ;;  %vm146_vm5 = vweird.f32 %v172_v26 }
 0x28e   :  { %vm147_vm7 = vmor %vm145_vm6, %vm146_vm5 }
 0x28f   :  { %v142_v28 = vsub.f32 1.0, %v141_v27 }
 0x291   :  { %v143_v30 = vmul.f32 %v172_v26, %v142_v28 }
 0x293   :  { %v144_v32 = vadd.f32 %v172_v26, %v143_v30 }
 0x295   :  { %v148_v34 = vsel %vm147_vm7, %v172_v26, %v144_v32 }
 0x296   :  { %v153_v35 = vsel %vm150_vm8, %v152_v33, %v148_v34 }
 0x297   :  { %v154_v36 = vmul.f32 %v170_v23, %v153_v35 }
 0x299   :  { %155 = vst.msk [vmem:[%s259_s7] sm:$0xff] %vm130_vm4, %v154_v36 }

</bundles_post_ra>
